<compile_context>
chip_gen: v7x
topology: tpu7x:2x2x1
jax: 0.10.0
libtpu: 0.0.40
codegen_flags: <defaults>
</compile_context>

<pallas_src>
import functools

import jax
import jax.numpy as jnp
from jax.experimental import pallas as pl
from jax.experimental.pallas import tpu as pltpu


def _ffnn_kernel(x_ref, w1_ref, b1_ref, w2_ref, b2_ref, w3_ref, b3_ref, o_ref,
                 *, compute_dtype):
    """One (feature, T_tile) column tile: (Linear+ReLU) x2 -> Linear -> Sigmoid.

    Weights are in nn.Linear's native (out, in) layout, biases are (out, 1) so
    they broadcast along the lane (time) axis. Dots accumulate in f32; bias add,
    ReLU and sigmoid stay in f32. The bf16 cast (if any) happens here, on data
    that is already in VMEM, so it costs no HBM traffic.
    """
    x = x_ref[...].astype(compute_dtype)                      # (in, tT)
    w1 = w1_ref[...].astype(compute_dtype)
    w2 = w2_ref[...].astype(compute_dtype)
    w3 = w3_ref[...].astype(compute_dtype)

    h1 = jnp.dot(w1, x, preferred_element_type=jnp.float32) + b1_ref[...]
    h1 = jnp.maximum(h1, 0.0)                                 # ReLU; Dropout = identity (eval)

    h2 = jnp.dot(w2, h1.astype(compute_dtype),
                 preferred_element_type=jnp.float32) + b2_ref[...]
    h2 = jnp.maximum(h2, 0.0)                                 # ReLU; Dropout = identity (eval)

    y = jnp.dot(w3, h2.astype(compute_dtype),
                preferred_element_type=jnp.float32) + b3_ref[...]
    o_ref[...] = jax.nn.sigmoid(y).astype(o_ref.dtype)        # Sigmoid


def ffnn_forward(x, params, *, tt=1024, compute_dtype=jnp.float32,
                 out_dtype=None, vmem_limit_bytes=48 * 1024 * 1024):
    """x: (B, input_size, T). Returns (B, output_size, T) in out_dtype (default x.dtype).

    tt: time (lane) tile width; rounded to a multiple of 128, shrunk for small
        T, for the v7x two-TC case (B == 1), and for the VMEM budget.
    compute_dtype: dtype of the MXU operands (f32 or bf16); cast happens inside
        the kernel, accumulation and elementwise math stay f32.
    """
    w1, b1, w2, b2, w3, b3 = params
    B, in_size, T = x.shape
    h1_size, h2_size, out_size = w1.shape[0], w2.shape[0], w3.shape[0]
    out_dtype = x.dtype if out_dtype is None else out_dtype

    # Lane-dense column tile: multiple of 128, not bigger than needed.
    lane = 128
    tt = max(lane, (tt // lane) * lane)
    t_ceil = pl.cdiv(T, lane) * lane
    tt_eff = min(tt, t_ceil)

    # v7x: with B == 1 the only megacore-parallel axes are (B, T-tiles); keep at
    # least 2 time tiles so both TensorCores get work. (No-op on v5e/v6e.)
    if B == 1:
        half = pl.cdiv(pl.cdiv(T, 2), lane) * lane
        if half < T:
            tt_eff = min(tt_eff, half)

    # Explicit VMEM budget (v7x: 64 MiB physical vs 128 MiB on v5e/v6e):
    # double-buffered x/out tiles + f32 intermediates + double-buffered params.
    param_bytes = sum(int(p.size) * p.dtype.itemsize for p in params)
    out_itemsize = jnp.dtype(out_dtype).itemsize

    def _step_bytes(t):
        io = 2 * (in_size * x.dtype.itemsize + out_size * out_itemsize) * t
        mid = (in_size + h1_size + h2_size + out_size) * t * 4   # f32 intermediates
        return io + mid + 2 * param_bytes

    while tt_eff > lane and _step_bytes(tt_eff) > vmem_limit_bytes // 2:
        tt_eff = max(lane, (tt_eff // 2 // lane) * lane)

    grid = (B, pl.cdiv(T, tt_eff))

    flops = 2 * B * T * (in_size * h1_size + h1_size * h2_size + h2_size * out_size)
    bytes_accessed = (int(x.size) * x.dtype.itemsize
                      + B * out_size * T * out_itemsize
                      + param_bytes)
    cost = pl.CostEstimate(flops=flops,
                           transcendentals=B * out_size * T,   # sigmoid
                           bytes_accessed=bytes_accessed)

    kernel = functools.partial(_ffnn_kernel, compute_dtype=compute_dtype)

    return pl.pallas_call(
        kernel,
        out_shape=jax.ShapeDtypeStruct((B, out_size, T), out_dtype),
        grid_spec=pltpu.PrefetchScalarGridSpec(
            num_scalar_prefetch=0,
            grid=grid,
            in_specs=[
                # Activation column tile; batch dim squeezed out of the kernel.
                pl.BlockSpec((None, in_size, tt_eff), lambda b, j: (b, 0, j)),
                # Grid-invariant weights/biases (full arrays).
                pl.BlockSpec((h1_size, in_size), lambda b, j: (0, 0)),
                pl.BlockSpec((h1_size, 1), lambda b, j: (0, 0)),
                pl.BlockSpec((h2_size, h1_size), lambda b, j: (0, 0)),
                pl.BlockSpec((h2_size, 1), lambda b, j: (0, 0)),
                pl.BlockSpec((out_size, h2_size), lambda b, j: (0, 0)),
                pl.BlockSpec((out_size, 1), lambda b, j: (0, 0)),
            ],
            out_specs=pl.BlockSpec((None, out_size, tt_eff),
                                   lambda b, j: (b, 0, j)),
        ),
        compiler_params=pltpu.CompilerParams(
            dimension_semantics=("parallel", "parallel"),
            vmem_limit_bytes=vmem_limit_bytes,
        ),
        cost_estimate=cost,
    )(x, w1, b1, w2, b2, w3, b3)


def init_params(key, input_size, hidden_layers, output_size):
    """nn.Linear-shaped params: weight (out, in), bias (out, 1), U(+-1/sqrt(fan_in))."""
    sizes = [input_size] + list(hidden_layers) + [output_size]
    params = []
    for fan_in, fan_out in zip(sizes[:-1], sizes[1:]):
        key, kw, kb = jax.random.split(key, 3)
        bound = fan_in ** -0.5
        w = jax.random.uniform(kw, (fan_out, fan_in), jnp.float32, -bound, bound)
        b = jax.random.uniform(kb, (fan_out, 1), jnp.float32, -bound, bound)
        params += [w, b]
    return tuple(params)


def reference_forward(x, params):
    """Pure-JAX reference of the PyTorch forward (eval mode)."""
    w1, b1, w2, b2, w3, b3 = params
    h = jnp.transpose(x, (0, 2, 1))                  # (B, T, in)
    h = jnp.maximum(h @ w1.T + b1[:, 0], 0.0)
    h = jnp.maximum(h @ w2.T + b2[:, 0], 0.0)
    y = jax.nn.sigmoid(h @ w3.T + b3[:, 0])
    return jnp.transpose(y, (0, 2, 1))               # (B, out, T)


if __name__ == "__main__":
    # Small shapes; T deliberately not a multiple of 128 to exercise the
    # ragged (masked) last time-tile.
    B, input_size, T = 2, 32, 200
    hidden_layers = [64, 64]
    output_size = 16

    key = jax.random.PRNGKey(0)
    kx, kp = jax.random.split(key)
    x = jax.random.normal(kx, (B, input_size, T), jnp.float32)
    params = init_params(kp, input_size, hidden_layers, output_size)

    ref = reference_forward(x, params)

    # f32 path. Tolerance accounts for the MXU's default f32 matmul precision
    # and a different accumulation order than the XLA reference (outputs in [0,1]).
    fwd = jax.jit(functools.partial(ffnn_forward, tt=1024))
    out = jax.block_until_ready(fwd(x, params))
    assert out.shape == (B, output_size, T), out.shape
    assert jnp.allclose(out, ref, atol=2e-3, rtol=2e-3), "f32 mismatch vs reference"

    # bf16 MXU-operand path (cast happens in-kernel, no extra HBM traffic);
    # looser tolerance since inter-layer activations are also bf16.
    fwd_bf16 = jax.jit(functools.partial(ffnn_forward, tt=1024,
                                         compute_dtype=jnp.bfloat16))
    out_bf16 = jax.block_until_ready(fwd_bf16(x, params))
    assert out_bf16.shape == (B, output_size, T), out_bf16.shape
    assert jnp.allclose(out_bf16, ref, atol=5e-2), "bf16 mismatch vs reference"

    # B == 1 path: exercises the v7x two-tile split (tt capped to 128 -> 2 time
    # tiles, second one ragged/masked).
    x1 = x[:1]
    ref1 = reference_forward(x1, params)
    out1 = jax.block_until_ready(jax.jit(functools.partial(ffnn_forward, tt=1024))(x1, params))
    assert out1.shape == (1, output_size, T), out1.shape
    assert jnp.allclose(out1, ref1, atol=2e-3, rtol=2e-3), "B=1 mismatch vs reference"

    print("KERNEL_OK")
</pallas_src>

<mosaic_0001>
module attributes {stable_mosaic.version = 11 : i64} {
  func.func @_ffnn_kernel(%arg0: i32, %arg1: i32, %arg2: memref<1x32x256xf32, #tpu.memory_space<vmem>>, %arg3: memref<64x32xf32, #tpu.memory_space<vmem>>, %arg4: memref<64x1xf32, #tpu.memory_space<vmem>>, %arg5: memref<64x64xf32, #tpu.memory_space<vmem>>, %arg6: memref<64x1xf32, #tpu.memory_space<vmem>>, %arg7: memref<16x64xf32, #tpu.memory_space<vmem>>, %arg8: memref<16x1xf32, #tpu.memory_space<vmem>>, %arg9: memref<1x16x256xf32, #tpu.memory_space<vmem>>) attributes {dimension_semantics = [#tpu.dimension_semantics<parallel>, #tpu.dimension_semantics<parallel>], iteration_bounds = array<i64: 2, 1>, scalar_prefetch = 0 : i64, scratch_operands = 0 : i64, tpu.core_type = #tpu.core_type<tc>, window_params = [{transform_indices = @transform_0, window_bounds = array<i64: 1, 32, 256>}, {pipeline_mode = #tpu.pipeline_mode<synchronous>, transform_indices = @transform_1, window_bounds = array<i64: 64, 32>}, {pipeline_mode = #tpu.pipeline_mode<synchronous>, transform_indices = @transform_2, window_bounds = array<i64: 64, 1>}, {pipeline_mode = #tpu.pipeline_mode<synchronous>, transform_indices = @transform_3, window_bounds = array<i64: 64, 64>}, {pipeline_mode = #tpu.pipeline_mode<synchronous>, transform_indices = @transform_4, window_bounds = array<i64: 64, 1>}, {pipeline_mode = #tpu.pipeline_mode<synchronous>, transform_indices = @transform_5, window_bounds = array<i64: 16, 64>}, {pipeline_mode = #tpu.pipeline_mode<synchronous>, transform_indices = @transform_6, window_bounds = array<i64: 16, 1>}, {transform_indices = @transform_7, window_bounds = array<i64: 1, 16, 256>}]} {
    %c0 = arith.constant 0 : index
    %c0_0 = arith.constant 0 : index
    %c0_1 = arith.constant 0 : index
    %0 = vector.load %arg2[%c0, %c0_0, %c0_1] : memref<1x32x256xf32, #tpu.memory_space<vmem>>, vector<1x32x256xf32>
    %1 = vector.shape_cast %0 : vector<1x32x256xf32> to vector<32x256xf32>
    %c0_2 = arith.constant 0 : index
    %c0_3 = arith.constant 0 : index
    %2 = vector.load %arg3[%c0_2, %c0_3] : memref<64x32xf32, #tpu.memory_space<vmem>>, vector<64x32xf32>
    %c0_4 = arith.constant 0 : index
    %c0_5 = arith.constant 0 : index
    %3 = vector.load %arg5[%c0_4, %c0_5] : memref<64x64xf32, #tpu.memory_space<vmem>>, vector<64x64xf32>
    %c0_6 = arith.constant 0 : index
    %c0_7 = arith.constant 0 : index
    %4 = vector.load %arg7[%c0_6, %c0_7] : memref<16x64xf32, #tpu.memory_space<vmem>>, vector<16x64xf32>
    %cst = arith.constant dense<0.000000e+00> : vector<64x256xf32>
    %5 = tpu.matmul %2, %1, %cst {dimension_numbers = #tpu.dot_dimension_numbers<[1], [0], [0], [1], [0, 0, 1, 1], [], []>} : vector<64x32xf32>, vector<32x256xf32>, vector<64x256xf32> -> vector<64x256xf32>
    %c0_8 = arith.constant 0 : index
    %c0_9 = arith.constant 0 : index
    %6 = vector.load %arg4[%c0_8, %c0_9] : memref<64x1xf32, #tpu.memory_space<vmem>>, vector<64x1xf32>
    %7 = vector.broadcast %6 : vector<64x1xf32> to vector<64x256xf32>
    %8 = arith.addf %5, %7 : vector<64x256xf32>
    %cst_10 = arith.constant 0.000000e+00 : f32
    %9 = vector.broadcast %cst_10 : f32 to vector<64x256xf32>
    %10 = arith.maximumf %8, %9 : vector<64x256xf32>
    %cst_11 = arith.constant dense<0.000000e+00> : vector<64x256xf32>
    %11 = tpu.matmul %3, %10, %cst_11 {dimension_numbers = #tpu.dot_dimension_numbers<[1], [0], [0], [1], [0, 0, 1, 1], [], []>} : vector<64x64xf32>, vector<64x256xf32>, vector<64x256xf32> -> vector<64x256xf32>
    %c0_12 = arith.constant 0 : index
    %c0_13 = arith.constant 0 : index
    %12 = vector.load %arg6[%c0_12, %c0_13] : memref<64x1xf32, #tpu.memory_space<vmem>>, vector<64x1xf32>
    %13 = vector.broadcast %12 : vector<64x1xf32> to vector<64x256xf32>
    %14 = arith.addf %11, %13 : vector<64x256xf32>
    %cst_14 = arith.constant 0.000000e+00 : f32
    %15 = vector.broadcast %cst_14 : f32 to vector<64x256xf32>
    %16 = arith.maximumf %14, %15 : vector<64x256xf32>
    %cst_15 = arith.constant dense<0.000000e+00> : vector<16x256xf32>
    %17 = tpu.matmul %4, %16, %cst_15 {dimension_numbers = #tpu.dot_dimension_numbers<[1], [0], [0], [1], [0, 0, 1, 1], [], []>} : vector<16x64xf32>, vector<64x256xf32>, vector<16x256xf32> -> vector<16x256xf32>
    %c0_16 = arith.constant 0 : index
    %c0_17 = arith.constant 0 : index
    %18 = vector.load %arg8[%c0_16, %c0_17] : memref<16x1xf32, #tpu.memory_space<vmem>>, vector<16x1xf32>
    %19 = vector.broadcast %18 : vector<16x1xf32> to vector<16x256xf32>
    %20 = arith.addf %17, %19 : vector<16x256xf32>
    %21 = arith.negf %20 : vector<16x256xf32>
    %22 = math.exp %21 : vector<16x256xf32>
    %cst_18 = arith.constant 1.000000e+00 : f32
    %23 = vector.broadcast %cst_18 : f32 to vector<16x256xf32>
    %24 = arith.addf %23, %22 : vector<16x256xf32>
    %25 = arith.divf %23, %24 : vector<16x256xf32>
    %c0_19 = arith.constant 0 : index
    %c0_20 = arith.constant 0 : index
    %c0_21 = arith.constant 0 : index
    %26 = vector.load %arg9[%c0_19, %c0_20, %c0_21] : memref<1x16x256xf32, #tpu.memory_space<vmem>>, vector<1x16x256xf32>
    %27 = vector.shape_cast %26 : vector<1x16x256xf32> to vector<16x256xf32>
    %28 = vector.shape_cast %25 : vector<16x256xf32> to vector<1x16x256xf32>
    tpu.vector_store %arg9[%c0_19, %c0_20, %c0_21], %28 {strides = array<i32>} : memref<1x16x256xf32, #tpu.memory_space<vmem>>, vector<1x16x256xf32>,
    return
  }
  func.func @transform_0(%arg0: i32, %arg1: i32) -> (i32, i32, i32) {
    %c0_i32 = arith.constant 0 : i32
    %c0_i32_0 = arith.constant 0 : i32
    return %arg0, %c0_i32, %arg1 : i32, i32, i32
  }
  func.func @transform_1(%arg0: i32, %arg1: i32) -> (i32, i32) {
    %c0_i32 = arith.constant 0 : i32
    %c0_i32_0 = arith.constant 0 : i32
    %c0_i32_1 = arith.constant 0 : i32
    return %c0_i32, %c0_i32_0 : i32, i32
  }
  func.func @transform_2(%arg0: i32, %arg1: i32) -> (i32, i32) {
    %c0_i32 = arith.constant 0 : i32
    %c0_i32_0 = arith.constant 0 : i32
    %c0_i32_1 = arith.constant 0 : i32
    return %c0_i32, %c0_i32_0 : i32, i32
  }
  func.func @transform_3(%arg0: i32, %arg1: i32) -> (i32, i32) {
    %c0_i32 = arith.constant 0 : i32
    %c0_i32_0 = arith.constant 0 : i32
    %c0_i32_1 = arith.constant 0 : i32
    return %c0_i32, %c0_i32_0 : i32, i32
  }
  func.func @transform_4(%arg0: i32, %arg1: i32) -> (i32, i32) {
    %c0_i32 = arith.constant 0 : i32
    %c0_i32_0 = arith.constant 0 : i32
    %c0_i32_1 = arith.constant 0 : i32
    return %c0_i32, %c0_i32_0 : i32, i32
  }
  func.func @transform_5(%arg0: i32, %arg1: i32) -> (i32, i32) {
    %c0_i32 = arith.constant 0 : i32
    %c0_i32_0 = arith.constant 0 : i32
    %c0_i32_1 = arith.constant 0 : i32
    return %c0_i32, %c0_i32_0 : i32, i32
  }
  func.func @transform_6(%arg0: i32, %arg1: i32) -> (i32, i32) {
    %c0_i32 = arith.constant 0 : i32
    %c0_i32_0 = arith.constant 0 : i32
    %c0_i32_1 = arith.constant 0 : i32
    return %c0_i32, %c0_i32_0 : i32, i32
  }
  func.func @transform_7(%arg0: i32, %arg1: i32) -> (i32, i32, i32) {
    %c0_i32 = arith.constant 0 : i32
    %c0_i32_0 = arith.constant 0 : i32
    return %arg0, %c0_i32, %arg1 : i32, i32, i32
  }
}

</mosaic_0001>

<bundles_post_ra>
// kernel: ffnn_forward.1
= control target key start
LH: loop header
LB: loop body
LE: loop exit
PB: predicated region body
PF: predicated region fallthrough
CT: control target
= control target key end

     0   :  { %12 = vsyncpa [#allocation3], 0  ;;  %s1494_s0 = inlined_call_operand.vmem [shape: f32[2,32,200], index: 0, kind: input, shape index: {}]   ;;  %s1495_s1 = inlined_call_operand.vmem [shape: f32[64,32], index: 1, kind: input, shape index: {}]   ;;  %s1496_s2 = inlined_call_operand.vmem [shape: f32[64,1], index: 2, kind: input, shape index: {}]   ;;  %s1497_s3 = inlined_call_operand.vmem [shape: f32[64,64], index: 3, kind: input, shape index: {}]   ;;  %s1498_s4 = inlined_call_operand.vmem [shape: f32[64,1], index: 4, kind: input, shape index: {}]   ;;  %s1499_s5 = inlined_call_operand.vmem [shape: f32[16,64], index: 5, kind: input, shape index: {}]   ;;  %s1500_s6 = inlined_call_operand.vmem [shape: f32[16,1], index: 6, kind: input, shape index: {}]   ;;  %s1501_s7 = inlined_call_operand.hbm [shape: f32[2,16,200], index: 7, kind: output, shape index: {}]  }
   0x1   :  { %14 = vsyncpa [#allocation3 + $0x1], 0  ;;  %s1235_s24 = smov 0   ;;  %s1237_s25 = smov 0  }
   0x2   :  { %s1239_s26 = smov 0   ;;  %s1241_s27 = smov 0  }
   0x3   :  { %s1243_s28 = smov 0   ;;  %s1245_s29 = smov 0  }
   0x4 LB: > { %s956_s30 = sadd.s32 4294967295, %s1188_s29   ;;  %s957_s8 = sadd.s32 4294967294, %s1188_s29   ;;  %s1188_s29 = sphi %s1245_s29, %s20_s29   ;;  %s1184_s28 = sphi %s1243_s28, %s1508_s28   ;;  %s1180_s27 = sphi %s1241_s27, %s1507_s27   ;;  %s1176_s26 = sphi %s1239_s26, %s1506_s26   ;;  %s1172_s25 = sphi %s1237_s25, %s1505_s25   ;;  %s1168_s24 = sphi %s1235_s24, %s1504_s24  }
   0x5   : > { %s32_s9 = sadd.s32 1, %s1184_s28  ;;  %s195_s10 = sadd.s32 1, %s1176_s26 }
   0x6   : > { %p34_p0 = scmp.ge.s32.totalorder %s32_s9, 2  ;;  %p205_p1 = scmp.ne.s32.totalorder %s1176_s26, %s1172_s25 }
   0x7   : > { %p206_p2 = scmp.eq.s32.totalorder %s956_s30, 1  ;;  %p211_p3 = scmp.ne.s32.totalorder %s1172_s25, %s1168_s24 }
   0x8   : > { %s1510_s9 = smov (%p34_p0, %s32_s9), 0  ;;  %p212_p5 = scmp.eq.s32.totalorder %s957_s8, 1 }
   0x9   : > { %p1275_p4 = por %p206_p2, %p205_p1  ;;  %s190_s12 = ssub.s32 %s1184_s28, %s1510_s9 }
   0xa   : > { %p960_p6 = scmp.ge.s32.totalorder %s1188_s29, 1  ;;  %p193_p7 = scmp.eq.s32.totalorder %s190_s12, 0 }
   0xb   : > { %p1282_p8 = por %p212_p5, %p211_p3  ;;  %p261_p9 = scmp.lt.s32.totalorder %s1188_s29, 3 }
   0xc   : > { %s1288_s14 = scalar_select %p193_p7, %s1176_s26, %s195_s10  }
   0xd   : > { %p262_p10 = pnand %p960_p6, %p261_p9 }
   0xe   : > { %p298_p11 = scmp.lt.s32.totalorder (!%p262_p10), %s1180_s27, 1  ;;  %v1190_v0 = vmov (!%p262_p10), 0.0   ;;  %v1191_v1 = vmov (!%p262_p10), 0   ;;  %v334_v2 = vld [vmem:[%s1496_s2] sm:$0xff] (!%p262_p10)  ;;  %v336_v3 = vld [vmem:[%s1496_s2 + $0x10] sm:$0xff] (!%p262_p10)  ;;  %v335_v4 = vld [vmem:[%s1496_s2 + $0x8] sm:$0xff] (!%p262_p10) }
   0xf   : > { %265 = sbr.rel (%p262_p10) target bundleno = 799 (0x31f), region = 48  ;;  %471 = vmatprep.mubr.f32.mxu0 (!%p262_p10), %v1190_v0  ;;  %673 = vmatprep.mubr.f32.mxu1 (!%p262_p10), %v1190_v0  ;;  %v337_v5 = vld [vmem:[%s1496_s2 + $0x18] sm:$0xff] (!%p262_p10)  ;;  %v338_v17 = vld [vmem:[%s1496_s2 + $0x20] sm:$0xff] (!%p262_p10)  ;;  %v339_v18 = vld [vmem:[%s1496_s2 + $0x28] sm:$0xff] (!%p262_p10)  ;;  %vm382_vm0 = vcmask (!%p262_p10), 261120   ;;  %vm584_vm1 = vcmask (!%p262_p10), 523264  }
  0x10   : > { %1092 = vset.pattern.permute.xlu0 (!%p262_p10), %v1191_v1  ;;  %1093 = vset.pattern.permute.xlu1 (!%p262_p10), %v1191_v1  ;;  %v340_v20 = vld [vmem:[%s1496_s2 + $0x30] sm:$0xff] (!%p262_p10)  ;;  %v341_v21 = vld [vmem:[%s1496_s2 + $0x38] sm:$0xff] (!%p262_p10)  ;;  %v316_v22 = vld [vmem:[%s1495_s1] sm:$0xff] (!%p262_p10)  ;;  %s294_s12 = sand.u32 (!%p262_p10), 1, %s1172_s25   ;;  %s992_s16 = sshll.u32 (!%p262_p10), %s1180_s27, 9 }
  0x11   : > { %344 = vperm.xlu0 (!%p262_p10), %1092, %v334_v2   ;;  %354 = vperm.xlu1 (!%p262_p10), %1093, %v336_v3   ;;  %v536_v23 = vld [vmem:[%s1498_s4] sm:$0xff] (!%p262_p10)  ;;  %v537_v24 = vld [vmem:[%s1498_s4 + $0x8] sm:$0xff] (!%p262_p10)  ;;  %v538_v26 = vld [vmem:[%s1498_s4 + $0x10] sm:$0xff] (!%p262_p10)  ;;  %s1444_s21 = scalar_lea.hbm (!%p262_p10), %s1501_s7, %s992_s16  ;;  %s1192_s23 = smov (!%p262_p10), [#allocation2]  }
  0x12   : > { %v317_v25 = vld [vmem:[%s1495_s1 + $0x8] sm:$0xff] (!%p262_p10)  ;;  %v539_v27 = vld [vmem:[%s1498_s4 + $0x18] sm:$0xff] (!%p262_p10)  ;;  %v318_v28 = vld [vmem:[%s1495_s1 + $0x10] sm:$0xff] (!%p262_p10)  ;;  %s1114_s30 = sshll.u32 (!%p262_p10), %s1192_s23, 4  ;;  %s1115_s30 = int_to_ptr.vmem [resolvable:$false] %s1114_s30 }
  0x13   : > { %v540_v29 = vld [vmem:[%s1498_s4 + $0x20] sm:$0xff] (!%p262_p10)  ;;  %v541_v30 = vld [vmem:[%s1498_s4 + $0x28] sm:$0xff] (!%p262_p10)  ;;  %v319_v31 = vld [vmem:[%s1495_s1 + $0x18] sm:$0xff] (!%p262_p10) }
  0x14   : > { %v542_v32 = vld [vmem:[%s1498_s4 + $0x30] sm:$0xff] (!%p262_p10)  ;;  %v543_v33 = vld [vmem:[%s1498_s4 + $0x38] sm:$0xff] (!%p262_p10)  ;;  %v320_v34 = vld [vmem:[%s1495_s1 + $0x20] sm:$0xff] (!%p262_p10) }
  0x15   : > { %349 = vperm.xlu0 (!%p262_p10), %1092, %v335_v4   ;;  %359 = vperm.xlu1 (!%p262_p10), %1093, %v337_v5   ;;  %v738_v35 = vld [vmem:[%s1500_s6] sm:$0xff] (!%p262_p10)  ;;  %v739_v36 = vld [vmem:[%s1500_s6 + $0x8] sm:$0xff] (!%p262_p10)  ;;  %v322_v38 = vld [vmem:[%s1495_s1 + $0x30] sm:$0xff] (!%p262_p10) }
  0x16   : > { %s299_s15 = scalar_select %p298_p11, %s1180_s27, 1  ;;  %v321_v37 = vld [vmem:[%s1495_s1 + $0x28] sm:$0xff]  ;;  %v323_v39 = vld [vmem:[%s1495_s1 + $0x38] sm:$0xff] }
  0x17   : > { %s1448_s27 = scalar_lea.sflag [#allocation3], %s294_s12 }
  0x18   : > { %s991_s20 = sshll.u32 %s299_s15, 6  ;;  %s961_s15 = sshll.u32 %s294_s12, 5 }
  0x19   : > { %s305_s8 = scalar_lea.vmem %s1494_s0, %s991_s20  ;;  %364 = vperm.xlu0 %1092, %v338_v17   ;;  %369 = vperm.xlu1 %1093, %v339_v18   ;;  %s296_s17 = scalar_lea.vmem [#allocation2], %s961_s15 }
  0x1a   : > { %v309_v6 = vld [vmem:[%s305_s8 + $0x8] sm:$0xff]  ;;  %v311_v7 = vld [vmem:[%s305_s8 + $0x18] sm:$0xff]  ;;  %v308_v8 = vld [vmem:[%s305_s8] sm:$0xff]  ;;  %s877_s18 = sshll.u32 %s296_s17, 4  ;;  %s1446_s18 = int_to_ptr.vmem [resolvable:$true] %s877_s18 }
  0x1b   : > { %v993_v9 = vpack.c.bf16 %v311_v7, %v309_v6  ;;  %v310_v10 = vld [vmem:[%s305_s8 + $0x10] sm:$0xff]  ;;  %v313_v11 = vld [vmem:[%s305_s8 + $0x28] sm:$0xff]  ;;  %v315_v12 = vld [vmem:[%s305_s8 + $0x38] sm:$0xff]  ;;  %s1110_s22 = scalar_lea.vmem %s1446_s18, 512  ;;  %p1117_p1 = scmp.lt.s32.totalorder %s1446_s18, %s1115_s30 }
  0x1c   : > { %v995_v13 = vpack.c.bf16 %v310_v10, %v308_v8  ;;  %v997_v14 = vpack.c.bf16 %v315_v12, %v313_v11  ;;  %v312_v15 = vld [vmem:[%s305_s8 + $0x20] sm:$0xff]  ;;  %v314_v16 = vld [vmem:[%s305_s8 + $0x30] sm:$0xff]  ;;  %p1111_p12 = scmp.ne.s32.totalorder %s1446_s18, %s1110_s22  ;;  %s1116_s8 = scalar_lea.vmem %s1115_s30, 1024 }
  0x1d   : > { %994 = vmatprep.subr.bf16.mxu0 %v993_v9  ;;  %v999_v19 = vpack.c.bf16 %v314_v16, %v312_v15  ;;  %374 = vperm.xlu0 %1092, %v340_v20   ;;  %p1118_p2 = scmp.lt.s32.totalorder %s1116_s8, %s1110_s22 }
  0x1e   : > { %996 = vmatpush1.bf16.msra.mxu0 %v995_v13  ;;  %379 = vperm.xlu1 %1093, %v341_v21   ;;  %p1112_p13 = pnand %p1111_p12, %p1275_p4 }
  0x1f   : > { %998 = vmatprep.subr.bf16.mxu0 %v997_v14  ;;  %p1119_p3 = por %p1118_p2, %p1117_p1 }
  0x20   : > { %p1113_p0 = pneg %p1112_p13 }
  0x21   : > { %546 = vperm.xlu0 %1092, %v536_v23  }
  0x22   : > { %1000 = vmatpush1.bf16.msra.mxu0 %v999_v19  ;;  %551 = vperm.xlu1 %1093, %v537_v24   ;;  %p1120_p5 = pnand %p1119_p3, %p1113_p0 }
  0x25   : > { %964 = vmatmul.mubr.msk.f32.vlgmr.msra.gmra.mrb[0].mxu0 %vm382_vm0, %v316_v22  ;;  %556 = vperm.xlu0 %1092, %v538_v26  }
  0x26   : > { %477 = vmatprep.mubr.f32.mxu0 %v1190_v0  ;;  %561 = vperm.xlu1 %1093, %v539_v27  }
  0x29   : > { %965 = vmatmul.mubr.msk.f32.gmra.mrb[2].mxu0 %vm382_vm0, %v317_v25  ;;  %566 = vperm.xlu0 %1092, %v540_v29  }
  0x2a   : > { %483 = vmatprep.mubr.f32.mxu0 %v1190_v0  ;;  %571 = vperm.xlu1 %1093, %v541_v30  }
  0x2d   : > { %966 = vmatmul.mubr.msk.f32.gmra.mrb[4].mxu0 %vm382_vm0, %v318_v28  ;;  %576 = vperm.xlu0 %1092, %v542_v32  }
  0x2e   : > { %489 = vmatprep.mubr.f32.mxu0 %v1190_v0  ;;  %581 = vperm.xlu1 %1093, %v543_v33  }
  0x31   : > { %967 = vmatmul.mubr.msk.f32.gmra.mrb[6].mxu0 %vm382_vm0, %v319_v31  ;;  %742 = vperm.xlu0 %1092, %v738_v35  }
  0x32   : > { %495 = vmatprep.mubr.f32.mxu0 %v1190_v0  ;;  %747 = vperm.xlu1 %1093, %v739_v36  }
  0x35   : > { %968 = vmatmul.mubr.msk.f32.gmra.mrb[8].mxu0 %vm382_vm0, %v320_v34 }
  0x36   : > { %501 = vmatprep.mubr.f32.mxu0 %v1190_v0 }
  0x39   : > { %969 = vmatmul.mubr.msk.f32.gmra.mrb[10].mxu0 %vm382_vm0, %v321_v37 }
  0x3a   : > { %507 = vmatprep.mubr.f32.mxu0 %v1190_v0 }
  0x3d   : > { %970 = vmatmul.mubr.msk.f32.gmra.mrb[12].mxu0 %vm382_vm0, %v322_v38 }
  0x3e   : > { %513 = vmatprep.mubr.f32.mxu0 %v1190_v0 }
  0x41   : > { %971 = vmatmul.mubr.msk.f32.gmra.mrb[14].mxu0 %vm382_vm0, %v323_v39 }
  0x42   : > { %820 = vmatprep.mubr.f32.mxu0 %v1190_v0 }
  0x90   : > { %v345_v40 = vpop.permute.xlu0 %344  ;;  %v355_v49 = vpop.permute.xlu1 %354 }
  0x94   : > { %v350_v44 = vpop.permute.xlu0 %349  ;;  %v360_v60 = vpop.permute.xlu1 %359 }
  0x98   : > { %v365_v10 = vpop.permute.xlu0 %364  ;;  %v370_v13 = vpop.permute.xlu1 %369 }
  0x9c   : > { %v375_v26 = vpop.permute.xlu0 %374 }
  0x9d   : > { %v380_v29 = vpop.permute.xlu1 %379 }
  0xf8   : > { %v473_v41 = vpop.f32.mrb[0].mxu0 }
  0xf9   : > { %v475_v42 = vpop.f32.mrb[1].mxu0  ;;  %v474_v43 = vadd.f32 %v473_v41, %v345_v40  ;;  %v324_v41 = vld [vmem:[%s1497_s3] sm:$0xff] }
  0xfa   : > { %v476_v45 = vadd.f32 %v475_v42, %v345_v40  ;;  %v325_v42 = vld [vmem:[%s1497_s3 + $0x8] sm:$0xff] }
  0xfb   : > { %v520_v51 = vmax.f32 %v474_v43, 0.0  ;;  %v326_v43 = vld [vmem:[%s1497_s3 + $0x10] sm:$0xff] }
  0xfc   : > { %v479_v46 = vpop.f32.mrb[2].mxu0  ;;  %v521_v53 = vmax.f32 %v476_v45, 0.0  ;;  %v328_v45 = vld [vmem:[%s1497_s3 + $0x20] sm:$0xff] }
  0xfd   : > { %v480_v47 = vadd.f32 %v479_v46, %v350_v44  ;;  %v481_v48 = vpop.f32.mrb[3].mxu0  ;;  %v329_v46 = vld [vmem:[%s1497_s3 + $0x28] sm:$0xff] }
  0xfe   : > { %v482_v50 = vadd.f32 %v481_v48, %v350_v44  ;;  %v327_v44 = vld [vmem:[%s1497_s3 + $0x18] sm:$0xff] }
  0xff   : > { %v522_v52 = vmax.f32 %v480_v47, 0.0  ;;  %v330_v47 = vld [vmem:[%s1497_s3 + $0x30] sm:$0xff]  ;;  %v331_v48 = vld [vmem:[%s1497_s3 + $0x38] sm:$0xff] }
 0x100   : > { %v523_v54 = vmax.f32 %v482_v50, 0.0  ;;  %v485_v55 = vpop.f32.mrb[4].mxu0 }
 0x101   : > { %v487_v56 = vpop.f32.mrb[5].mxu0  ;;  %v1003_v57 = vpack.c.bf16 %v522_v52, %v520_v51  ;;  %v486_v59 = vadd.f32 %v485_v55, %v355_v49  ;;  %v547_v51 = vpop.permute.xlu0 %546 }
 0x102   : > { %v1001_v58 = vpack.c.bf16 %v523_v54, %v521_v53  ;;  %v488_v61 = vadd.f32 %v487_v56, %v355_v49  ;;  %v552_v53 = vpop.permute.xlu1 %551 }
 0x103   : > { %v524_v3 = vmax.f32 %v486_v59, 0.0 }
 0x104   : > { %v491_v62 = vpop.f32.mrb[6].mxu0  ;;  %1002 = vmatprep.subr.bf16.mxu1 %v1001_v58  ;;  %v525_v5 = vmax.f32 %v488_v61, 0.0 }
 0x105   : > { %v492_v63 = vadd.f32 %v491_v62, %v360_v60  ;;  %v493_v1 = vpop.f32.mrb[7].mxu0  ;;  %1004 = vmatpush1.bf16.msra.mxu1 %v1003_v57 }
 0x106   : > { %v494_v2 = vadd.f32 %v493_v1, %v360_v60 }
 0x107   : > { %v526_v4 = vmax.f32 %v492_v63, 0.0 }
 0x108   : > { %v527_v6 = vmax.f32 %v494_v2, 0.0  ;;  %v497_v7 = vpop.f32.mrb[8].mxu0 }
 0x109   : > { %v1007_v8 = vpack.c.bf16 %v526_v4, %v524_v3  ;;  %v499_v9 = vpop.f32.mrb[9].mxu0  ;;  %v498_v12 = vadd.f32 %v497_v7, %v365_v10  ;;  %v557_v3 = vpop.permute.xlu0 %556 }
 0x10a   : > { %v1005_v11 = vpack.c.bf16 %v527_v6, %v525_v5  ;;  %v500_v14 = vadd.f32 %v499_v9, %v365_v10  ;;  %v562_v6 = vpop.permute.xlu1 %561 }
 0x10b   : > { %v528_v19 = vmax.f32 %v498_v12, 0.0 }
 0x10c   : > { %v503_v15 = vpop.f32.mrb[10].mxu0  ;;  %1006 = vmatprep.subr.bf16.mxu1 %v1005_v11  ;;  %v529_v21 = vmax.f32 %v500_v14, 0.0 }
 0x10d   : > { %v504_v16 = vadd.f32 %v503_v15, %v370_v13  ;;  %v505_v17 = vpop.f32.mrb[11].mxu0  ;;  %1008 = vmatpush1.bf16.msra.mxu1 %v1007_v8 }
 0x10e   : > { %v506_v18 = vadd.f32 %v505_v17, %v370_v13 }
 0x10f   : > { %v530_v20 = vmax.f32 %v504_v16, 0.0 }
 0x110   : > { %v531_v22 = vmax.f32 %v506_v18, 0.0  ;;  %v509_v23 = vpop.f32.mrb[12].mxu0 }
 0x111   : > { %v1011_v24 = vpack.c.bf16 %v530_v20, %v528_v19  ;;  %v511_v25 = vpop.f32.mrb[13].mxu0  ;;  %v510_v28 = vadd.f32 %v509_v23, %v375_v26  ;;  %v567_v19 = vpop.permute.xlu0 %566 }
 0x112   : > { %v1009_v27 = vpack.c.bf16 %v531_v22, %v529_v21  ;;  %v512_v30 = vadd.f32 %v511_v25, %v375_v26  ;;  %v572_v22 = vpop.permute.xlu1 %571 }
 0x113   : > { %v532_v35 = vmax.f32 %v510_v28, 0.0 }
 0x114   : > { %v515_v31 = vpop.f32.mrb[14].mxu0  ;;  %1010 = vmatprep.subr.bf16.mxu1 %v1009_v27  ;;  %v533_v37 = vmax.f32 %v512_v30, 0.0 }
 0x115   : > { %v516_v32 = vadd.f32 %v515_v31, %v380_v29  ;;  %v517_v33 = vpop.f32.mrb[15].mxu0  ;;  %1012 = vmatpush1.bf16.msra.mxu1 %v1011_v24 }
 0x116   : > { %v518_v34 = vadd.f32 %v517_v33, %v380_v29 }
 0x117   : > { %v534_v36 = vmax.f32 %v516_v32, 0.0 }
 0x118   : > { %v535_v38 = vmax.f32 %v518_v34, 0.0 }
 0x119   : > { %v1015_v39 = vpack.c.bf16 %v534_v36, %v532_v35  ;;  %v577_v35 = vpop.permute.xlu0 %576 }
 0x11a   : > { %v1013_v40 = vpack.c.bf16 %v535_v38, %v533_v37  ;;  %v582_v38 = vpop.permute.xlu1 %581 }
 0x11c   : > { %1014 = vmatprep.subr.bf16.mxu1 %v1013_v40 }
 0x11d   : > { %1016 = vmatpush1.bf16.msra.mxu1 %v1015_v39 }
 0x120   : > { %972 = vmatmul.mubr.msk.f32.vlgmr.msra.gmra.mrb[0].mxu1 %vm584_vm1, %v324_v41 }
 0x121   : > { %679 = vmatprep.mubr.f32.mxu1 %v1190_v0 }
 0x124   : > { %973 = vmatmul.mubr.msk.f32.gmra.mrb[2].mxu1 %vm584_vm1, %v325_v42 }
 0x125   : > { %685 = vmatprep.mubr.f32.mxu1 %v1190_v0 }
 0x128   : > { %974 = vmatmul.mubr.msk.f32.gmra.mrb[4].mxu1 %vm584_vm1, %v326_v43 }
 0x129   : > { %691 = vmatprep.mubr.f32.mxu1 %v1190_v0 }
 0x12c   : > { %975 = vmatmul.mubr.msk.f32.gmra.mrb[6].mxu1 %vm584_vm1, %v327_v44 }
 0x12d   : > { %697 = vmatprep.mubr.f32.mxu1 %v1190_v0 }
 0x130   : > { %976 = vmatmul.mubr.msk.f32.gmra.mrb[8].mxu1 %vm584_vm1, %v328_v45 }
 0x131   : > { %703 = vmatprep.mubr.f32.mxu1 %v1190_v0 }
 0x134   : > { %977 = vmatmul.mubr.msk.f32.gmra.mrb[10].mxu1 %vm584_vm1, %v329_v46 }
 0x135   : > { %709 = vmatprep.mubr.f32.mxu1 %v1190_v0 }
 0x138   : > { %978 = vmatmul.mubr.msk.f32.gmra.mrb[12].mxu1 %vm584_vm1, %v330_v47 }
 0x139   : > { %715 = vmatprep.mubr.f32.mxu1 %v1190_v0 }
 0x13c   : > { %979 = vmatmul.mubr.msk.f32.gmra.mrb[14].mxu1 %vm584_vm1, %v331_v48 }
 0x1f3   : > { %v675_v49 = vpop.f32.mrb[0].mxu1 }
 0x1f4   : > { %v677_v50 = vpop.f32.mrb[1].mxu1  ;;  %v676_v52 = vadd.f32 %v675_v49, %v547_v51 }
 0x1f5   : > { %v678_v54 = vadd.f32 %v677_v50, %v547_v51  ;;  %v332_v50 = vld [vmem:[%s1499_s5] sm:$0xff]  ;;  %v333_v51 = vld [vmem:[%s1499_s5 + $0x8] sm:$0xff] }
 0x1f6   : > { %v722_v59 = vmax.f32 %v676_v52, 0.0  ;;  %v743_v52 = vpop.permute.xlu0 %742 }
 0x1f7   : > { %v681_v55 = vpop.f32.mrb[2].mxu1  ;;  %v723_v61 = vmax.f32 %v678_v54, 0.0 }
 0x1f8   : > { %v682_v56 = vadd.f32 %v681_v55, %v552_v53  ;;  %v683_v57 = vpop.f32.mrb[3].mxu1 }
 0x1f9   : > { %v684_v58 = vadd.f32 %v683_v57, %v552_v53 }
 0x1fa   : > { %v724_v60 = vmax.f32 %v682_v56, 0.0 }
 0x1fb   : > { %v725_v62 = vmax.f32 %v684_v58, 0.0  ;;  %v687_v63 = vpop.f32.mrb[4].mxu1  ;;  %v748_v58 = vpop.permute.xlu1 %747 }
 0x1fc   : > { %v1019_v1 = vpack.c.bf16 %v724_v60, %v722_v59  ;;  %v689_v2 = vpop.f32.mrb[5].mxu1  ;;  %v688_v5 = vadd.f32 %v687_v63, %v557_v3 }
 0x1fd   : > { %v1017_v4 = vpack.c.bf16 %v725_v62, %v723_v61  ;;  %v690_v7 = vadd.f32 %v689_v2, %v557_v3 }
 0x1fe   : > { %v726_v12 = vmax.f32 %v688_v5, 0.0 }
 0x1ff   : > { %v693_v8 = vpop.f32.mrb[6].mxu1  ;;  %1018 = vmatprep.subr.bf16.mxu0 %v1017_v4  ;;  %v727_v14 = vmax.f32 %v690_v7, 0.0 }
 0x200   : > { %v694_v9 = vadd.f32 %v693_v8, %v562_v6  ;;  %v695_v10 = vpop.f32.mrb[7].mxu1  ;;  %1020 = vmatpush1.bf16.msra.mxu0 %v1019_v1 }
 0x201   : > { %v696_v11 = vadd.f32 %v695_v10, %v562_v6 }
 0x202   : > { %v728_v13 = vmax.f32 %v694_v9, 0.0 }
 0x203   : > { %v729_v15 = vmax.f32 %v696_v11, 0.0  ;;  %v699_v16 = vpop.f32.mrb[8].mxu1 }
 0x204   : > { %v1023_v17 = vpack.c.bf16 %v728_v13, %v726_v12  ;;  %v701_v18 = vpop.f32.mrb[9].mxu1  ;;  %v700_v21 = vadd.f32 %v699_v16, %v567_v19 }
 0x205   : > { %v1021_v20 = vpack.c.bf16 %v729_v15, %v727_v14  ;;  %v702_v23 = vadd.f32 %v701_v18, %v567_v19 }
 0x206   : > { %v730_v28 = vmax.f32 %v700_v21, 0.0 }
 0x207   : > { %v705_v24 = vpop.f32.mrb[10].mxu1  ;;  %1022 = vmatprep.subr.bf16.mxu0 %v1021_v20  ;;  %v731_v30 = vmax.f32 %v702_v23, 0.0 }
 0x208   : > { %v706_v25 = vadd.f32 %v705_v24, %v572_v22  ;;  %v707_v26 = vpop.f32.mrb[11].mxu1  ;;  %1024 = vmatpush1.bf16.msra.mxu0 %v1023_v17 }
 0x209   : > { %v708_v27 = vadd.f32 %v707_v26, %v572_v22 }
 0x20a   : > { %v732_v29 = vmax.f32 %v706_v25, 0.0 }
 0x20b   : > { %v733_v31 = vmax.f32 %v708_v27, 0.0  ;;  %v711_v32 = vpop.f32.mrb[12].mxu1 }
 0x20c   : > { %v1027_v33 = vpack.c.bf16 %v732_v29, %v730_v28  ;;  %v713_v34 = vpop.f32.mrb[13].mxu1  ;;  %v712_v37 = vadd.f32 %v711_v32, %v577_v35 }
 0x20d   : > { %v1025_v36 = vpack.c.bf16 %v733_v31, %v731_v30  ;;  %v714_v39 = vadd.f32 %v713_v34, %v577_v35 }
 0x20e   : > { %v734_v44 = vmax.f32 %v712_v37, 0.0 }
 0x20f   : > { %v717_v40 = vpop.f32.mrb[14].mxu1  ;;  %1026 = vmatprep.subr.bf16.mxu0 %v1025_v36  ;;  %v735_v46 = vmax.f32 %v714_v39, 0.0 }
 0x210   : > { %v718_v41 = vadd.f32 %v717_v40, %v582_v38  ;;  %v719_v42 = vpop.f32.mrb[15].mxu1  ;;  %1028 = vmatpush1.bf16.msra.mxu0 %v1027_v33 }
 0x211   : > { %v720_v43 = vadd.f32 %v719_v42, %v582_v38 }
 0x212   : > { %v736_v45 = vmax.f32 %v718_v41, 0.0 }
 0x213   : > { %v737_v47 = vmax.f32 %v720_v43, 0.0 }
 0x214   : > { %v1031_v48 = vpack.c.bf16 %v736_v45, %v734_v44 }
 0x215   : > { %v1029_v49 = vpack.c.bf16 %v737_v47, %v735_v46 }
 0x217   : > { %1030 = vmatprep.subr.bf16.mxu0 %v1029_v49 }
 0x218   : > { %1032 = vmatpush1.bf16.msra.mxu0 %v1031_v48 }
 0x21b   : > { %980 = vmatmul.mubr.msk.f32.vlgmr.msra.gmra.mrb[16].mxu0 %vm584_vm1, %v332_v50 }
 0x21c   : > { %826 = vmatprep.mubr.f32.mxu0 %v1190_v0 }
 0x21f   : > { %981 = vmatmul.mubr.msk.f32.gmra.mrb[18].mxu0 %vm584_vm1, %v333_v51 }
 0x2ee   : > { %v822_v53 = vpop.f32.mrb[16].mxu0 }
 0x2ef   : > { %v823_v54 = vadd.f32 %v822_v53, %v743_v52  ;;  %v824_v55 = vpop.f32.mrb[17].mxu0 }
 0x2f0   : > { %v825_v56 = vadd.f32 %v824_v55, %v743_v52 }
 0x2f1   : > { %v982_v57 = vmul.f32 -1.442695, %v823_v54 }
 0x2f2   : > { %v983_v59 = vmul.f32 -1.442695, %v825_v56  ;;  %v828_v60 = vpop.f32.mrb[18].mxu0 }
 0x2f3   : > { %1094 = vpow2.f32 %v982_v57  ;;  %v829_v61 = vadd.f32 %v828_v60, %v748_v58  ;;  %v830_v62 = vpop.f32.mrb[19].mxu0 }
 0x2f4   : > { %1096 = vpow2.f32 %v983_v59  ;;  %v831_v0 = vadd.f32 %v830_v62, %v748_v58 }
 0x2f5   : > { %v984_v63 = vmul.f32 -1.442695, %v829_v61 }
 0x2f6   : > { %v985_v1 = vmul.f32 -1.442695, %v831_v0 }
 0x2f7   : > { %1098 = vpow2.f32 %v984_v63 }
 0x2f8   : > { %1100 = vpow2.f32 %v985_v1 }
 0x2fd   : > { %v1095_v2 = vpop.eup %1094 }
 0x2fe   : > { %v1097_v3 = vpop.eup %1096  ;;  %v845_v4 = vadd.f32 1.0, %v1095_v2 }
 0x2ff   : > { %v846_v5 = vadd.f32 1.0, %v1097_v3 }
 0x300   : > { %1102 = vrcp.f32 %v845_v4 }
 0x301   : > { %v1099_v6 = vpop.eup %1098  ;;  %1104 = vrcp.f32 %v846_v5 }
 0x302   : > { %v1101_v7 = vpop.eup %1100  ;;  %v847_v8 = vadd.f32 1.0, %v1099_v6 }
 0x303   : > { %v848_v9 = vadd.f32 1.0, %v1101_v7 }
 0x304   : > { %1106 = vrcp.f32 %v847_v8 }
 0x305   : > { %1108 = vrcp.f32 %v848_v9 }
 0x30a   : > { %v1103_v10 = vpop.eup %1102 }
 0x30b   : > { %v1105_v11 = vpop.eup %1104  ;;  %857 = vst [vmem:[%s296_s17] sm:$0xff] %v1103_v10 }
 0x30c   : > { %858 = vst [vmem:[%s296_s17 + $0x8] sm:$0xff] %v1105_v11 }
 0x30e   : > { %v1107_v12 = vpop.eup %1106 }
 0x30f   : > { %v1109_v13 = vpop.eup %1108  ;;  %859 = vst [vmem:[%s296_s17 + $0x10] sm:$0xff] %v1107_v12 }
 0x310   : > { %860 = vst [vmem:[%s296_s17 + $0x18] sm:$0xff] %v1109_v13 }
 0x311   : > { %1123 = shalt.err (!%p1120_p5)
}
 0x312   : > { %s1124_s10 = scalar_lea.hbm %s1444_s21, 512  ;;  %s1128_s16 = scalar_lea.hbm %s1501_s7, 1024 }
 0x313   : > { %p1125_p6 = scmp.ne.s32.totalorder %s1444_s21, %s1124_s10  ;;  %p1129_p10 = scmp.lt.u32.totalorder %s1444_s21, %s1501_s7 }
 0x314   : > { %p1130_p11 = scmp.lt.u32.totalorder %s1128_s16, %s1124_s10  ;;  %p1132_p13 = scmp.lt.u32.totalorder %s1124_s10, %s1444_s21 }
 0x315   : > { %p1126_p7 = pnand %p1125_p6, %p1275_p4 }
 0x316   : > { %p1131_p12 = por %p1130_p11, %p1129_p10 }
 0x317   : > { %p1127_p9 = pneg %p1126_p7 }
 0x318   : > { %p1133_p0 = por %p1132_p13, %p1131_p12 }
 0x31a   : > { %p1134_p1 = pnand %p1133_p0, %p1127_p9 }
 0x31c   : > { %1137 = shalt.err (!%p1134_p1)
}
 0x31d   : > { %s1193_s20 = smov 256   ;;  %s1194_s22 = smov 16  }
 0x31e   : > { %1033 = dma.vmem_to_hbm [thread:$0]  (%p1275_p4), %s1446_s18, 512, %s1444_s21, %s1448_s27, %s1193_s20, %s1193_s20, %s1194_s22  }
 0x31f PF: > { %p1039_p2 = scmp.ge.s32.totalorder %s1188_s29, 2  ;;  %s892_s23 = sand.u32 1, %s1168_s24  }
 0x320   : > { %s893_s30 = scalar_lea.sflag [#allocation3], %s892_s23 }
 0x321   : > { %p1036_p3 = pnand %p1039_p2, %p1282_p8 }
 0x323   : > { %1163 = dma.done.wait (!%p1036_p3), %s893_s30, 512  }
 0x324   : > { %1165 = vsyncadd (!%p1036_p3), %s893_s30, 4294966784  ;;  %s20_s29 = sadd.s32 1, %s1188_s29   ;;  %s1504_s24 = smov %s1172_s25 }
 0x325   : > { %p17_p5 = scmp.ge.s32.totalorder %s20_s29, 4   ;;  %s1505_s25 = smov %s1176_s26 }
 0x326   : > { %s1506_s26 = smov %s1288_s14  ;;  %s1507_s27 = smov %s1184_s28 }
 0x327   : > { %s1508_s28 = smov %s1510_s9  ;;  %19 = sbr.rel (!%p17_p5) target bundleno = 4 (0x4), region = 83 }
 0x32e   :  { %898 = vsyncpa [#allocation3], 1 }
 0x32f   :  { %900 = vsyncpa [#allocation3 + $0x1], 1 }

</bundles_post_ra>
